<compile_context>
chip_gen: v7x
topology: tpu7x:2x2x1
jax: 0.10.0
libtpu: 0.0.40
codegen_flags: <defaults>
</compile_context>

<pallas_src>
import functools

import jax
import jax.numpy as jnp
from jax.experimental import pallas as pl
from jax.experimental.pallas import tpu as pltpu


def basic_block_kernel(x_ref, w1_ref, b1_ref, w2_ref, b2_ref, o_ref, *,
                       seq_len, block_n):
    """x_ref: (block_n, C, Lp).  w*_ref: (3, P, Cin) per-tap weights ordered
    [tap@l-1, tap@l, tap@l+1] with BN scale folded in.  b*_ref: (P, 1) folded
    BN bias (f32).  o_ref: (block_n, P, Lp)."""
    Lp = x_ref.shape[2]

    # Per-sequence boundary keep-masks, built ONCE per grid step and shared by
    # both convs and every batch row.  No modulo: each row is one sequence.
    pos = jax.lax.broadcasted_iota(jnp.int32, (1, Lp), 1)
    keep_prev = pos != 0                 # l == 0 has no left neighbour
    keep_next = pos != (seq_len - 1)     # l == L-1 has no right neighbour

    def conv3(v, w_ref, b_ref):
        # Three accumulated (P, C) @ (C, Lp) dots — no (3C, Lp) concat temp.
        v_prev = jnp.where(keep_prev, pltpu.roll(v, shift=1, axis=1), 0.0)
        v_next = jnp.where(keep_next, pltpu.roll(v, shift=Lp - 1, axis=1), 0.0)
        acc = jnp.dot(w_ref[0], v_prev, preferred_element_type=jnp.float32)
        acc += jnp.dot(w_ref[1], v, preferred_element_type=jnp.float32)
        acc += jnp.dot(w_ref[2], v_next, preferred_element_type=jnp.float32)
        return acc + b_ref[...]          # BN bias (scale already in weights)

    for b in range(block_n):             # static unroll; block_n is small
        x = x_ref[b]                                        # (C, Lp), native dtype
        h = conv3(x, w1_ref, b1_ref)                        # conv1 + bn1 (f32)
        h = jnp.maximum(h, 0.0)                             # relu
        h = conv3(h.astype(x.dtype), w2_ref, b2_ref)        # conv2 + bn2
        h = jnp.maximum(h + x.astype(jnp.float32), 0.0)     # residual + relu
        o_ref[b] = h.astype(o_ref.dtype)


def _pick_block_n(N, C, P, Lp, itemsize, budget_bytes=10 << 20):
    """Largest batch chunk that (a) divides N, (b) keeps the grid at >= 2
    steps (>= 4 when possible) for pipelining / v7x megacore, and (c) fits a
    per-step VMEM byte budget (double-buffered I/O + f32 intermediates)."""
    target_steps = min(4, N)
    best = 1
    for bn in range(1, N + 1):
        if N % bn:
            continue
        if N // bn < target_steps:
            break                         # larger bn only reduces steps further
        io_bytes = 2 * bn * (C + P) * Lp * itemsize       # double-buffered in+out
        tmp_bytes = bn * (3 * C + 3 * P) * Lp * 4         # live f32 intermediates
        if io_bytes + tmp_bytes <= budget_bytes:
            best = bn
    return best


def _prep_conv_weight(w_oik, bn_scale):
    """w_oik: (P, Cin, 3) PyTorch layout -> (3, P, Cin) per-tap stack ordered
    [tap@l-1, tap@l, tap@l+1], with eval-mode BN scale folded per out-chan."""
    w = jnp.transpose(w_oik, (2, 0, 1))                   # (3, P, Cin)
    return w * bn_scale.reshape(1, -1, 1)


def basic_block(x, w1_oik, bn1_scale, bn1_bias, w2_oik, bn2_scale, bn2_bias):
    """x: (N, C, L).  w1_oik: (P, C, 3), w2_oik: (P, P, 3) (PyTorch layout).
    bn*_scale / bn*_bias: (P,) folded eval-mode BatchNorm params."""
    N, C, L = x.shape
    P = w1_oik.shape[0]
    assert P == C, "identity residual requires planes == inplanes"

    # Pad the sequence dim to a lane-dense multiple of 128 (masks keep the
    # conv math correct at the true sequence boundary; pad cols are sliced off).
    Lp = ((L + 127) // 128) * 128
    x_in = x if Lp == L else jnp.pad(x, ((0, 0), (0, 0), (0, Lp - L)))

    w1 = _prep_conv_weight(w1_oik, bn1_scale).astype(x.dtype)   # (3, P, C)
    w2 = _prep_conv_weight(w2_oik, bn2_scale).astype(x.dtype)   # (3, P, P)
    b1 = bn1_bias.reshape(P, 1).astype(jnp.float32)
    b2 = bn2_bias.reshape(P, 1).astype(jnp.float32)

    itemsize = jnp.dtype(x.dtype).itemsize
    block_n = _pick_block_n(N, C, P, Lp, itemsize)
    grid = (N // block_n,)

    out = pl.pallas_call(
        functools.partial(basic_block_kernel, seq_len=L, block_n=block_n),
        out_shape=jax.ShapeDtypeStruct((N, P, Lp), x.dtype),
        grid_spec=pl.GridSpec(
            grid=grid,
            in_specs=[
                pl.BlockSpec((block_n, C, Lp), lambda i: (i, 0, 0)),   # x block
                pl.BlockSpec((3, P, C), lambda i: (0, 0, 0)),          # w1 taps
                pl.BlockSpec((P, 1), lambda i: (0, 0)),                # bn1 bias
                pl.BlockSpec((3, P, P), lambda i: (0, 0, 0)),          # w2 taps
                pl.BlockSpec((P, 1), lambda i: (0, 0)),                # bn2 bias
            ],
            out_specs=pl.BlockSpec((block_n, P, Lp), lambda i: (i, 0, 0)),
        ),
        compiler_params=pltpu.CompilerParams(
            dimension_semantics=("parallel",),
            vmem_limit_bytes=32 * 1024 * 1024),
    )(x_in, w1, b1, w2, b2)

    if Lp != L:
        out = out[:, :, :L]
    return out


def basic_block_reference(x, w1_oik, s1, b1, w2_oik, s2, b2):
    """Pure-JAX reference (lax conv).  w*_oik: (out, in, k) like PyTorch."""
    dn = ("NCH", "OIH", "NCH")

    def conv(xx, w):
        return jax.lax.conv_general_dilated(
            xx, w, window_strides=(1,), padding=((1, 1),),
            dimension_numbers=dn)

    out = conv(x, w1_oik) * s1.reshape(1, -1, 1) + b1.reshape(1, -1, 1)
    out = jnp.maximum(out, 0.0)
    out = conv(out, w2_oik) * s2.reshape(1, -1, 1) + b2.reshape(1, -1, 1)
    out = jnp.maximum(out + x, 0.0)
    return out


def _fold_bn(gamma, beta, mean, var, eps=1e-5):
    scale = gamma / jnp.sqrt(var + eps)
    bias = beta - mean * scale
    return scale, bias


def _make_params(key, C, P):
    keys = jax.random.split(key, 10)
    w1 = jax.random.normal(keys[0], (P, C, 3), jnp.float32) / (3 * C) ** 0.5
    w2 = jax.random.normal(keys[1], (P, P, 3), jnp.float32) / (3 * P) ** 0.5
    g1 = 1.0 + 0.1 * jax.random.normal(keys[2], (P,), jnp.float32)
    be1 = 0.1 * jax.random.normal(keys[3], (P,), jnp.float32)
    m1 = 0.1 * jax.random.normal(keys[4], (P,), jnp.float32)
    v1 = jnp.abs(1.0 + 0.1 * jax.random.normal(keys[5], (P,), jnp.float32))
    g2 = 1.0 + 0.1 * jax.random.normal(keys[6], (P,), jnp.float32)
    be2 = 0.1 * jax.random.normal(keys[7], (P,), jnp.float32)
    m2 = 0.1 * jax.random.normal(keys[8], (P,), jnp.float32)
    v2 = jnp.abs(1.0 + 0.1 * jax.random.normal(keys[9], (P,), jnp.float32))
    s1, b1 = _fold_bn(g1, be1, m1, v1)
    s2, b2 = _fold_bn(g2, be2, m2, v2)
    return w1, s1, b1, w2, s2, b2


def _run_case(key, N, C, L):
    kx, kp = jax.random.split(key)
    x = jax.random.normal(kx, (N, C, L), jnp.float32)
    w1, s1, b1, w2, s2, b2 = _make_params(kp, C, C)
    out = basic_block(x, w1, s1, b1, w2, s2, b2)
    out = jax.block_until_ready(out)
    ref = basic_block_reference(x, w1, s1, b1, w2, s2, b2)
    assert out.shape == (N, C, L)
    err = float(jnp.max(jnp.abs(out - ref)))
    assert jnp.allclose(out, ref, rtol=1e-4, atol=1e-4), err


if __name__ == "__main__":
    key = jax.random.PRNGKey(0)
    k1, k2 = jax.random.split(key)

    # Main case: batch=2, inplanes=planes=8, sequence length 128 (lane-dense).
    _run_case(k1, N=2, C=8, L=128)
    # Non-128-multiple sequence length exercises the padding + boundary masks.
    _run_case(k2, N=4, C=16, L=96)

    print("KERNEL_OK")
</pallas_src>

<mosaic_0001>
module attributes {stable_mosaic.version = 11 : i64} {
  func.func @basic_block_kernel(%arg0: i32, %arg1: memref<1x8x128xf32, #tpu.memory_space<vmem>>, %arg2: memref<3x8x8xf32, #tpu.memory_space<vmem>>, %arg3: memref<8x1xf32, #tpu.memory_space<vmem>>, %arg4: memref<3x8x8xf32, #tpu.memory_space<vmem>>, %arg5: memref<8x1xf32, #tpu.memory_space<vmem>>, %arg6: memref<1x8x128xf32, #tpu.memory_space<vmem>>) attributes {dimension_semantics = [#tpu.dimension_semantics<parallel>], iteration_bounds = array<i64: 2>, scalar_prefetch = 0 : i64, scratch_operands = 0 : i64, tpu.core_type = #tpu.core_type<tc>, window_params = [{transform_indices = @transform_0, window_bounds = array<i64: 1, 8, 128>}, {pipeline_mode = #tpu.pipeline_mode<synchronous>, transform_indices = @transform_1, window_bounds = array<i64: 3, 8, 8>}, {pipeline_mode = #tpu.pipeline_mode<synchronous>, transform_indices = @transform_2, window_bounds = array<i64: 8, 1>}, {pipeline_mode = #tpu.pipeline_mode<synchronous>, transform_indices = @transform_3, window_bounds = array<i64: 3, 8, 8>}, {pipeline_mode = #tpu.pipeline_mode<synchronous>, transform_indices = @transform_4, window_bounds = array<i64: 8, 1>}, {transform_indices = @transform_5, window_bounds = array<i64: 1, 8, 128>}]} {
    %0 = tpu.iota {dimensions = array<i32: 1>} : vector<1x128xi32>
    %c0_i32 = arith.constant 0 : i32
    %1 = vector.broadcast %c0_i32 : i32 to vector<1x128xi32>
    %2 = arith.cmpi ne, %0, %1 : vector<1x128xi32>
    %c127_i32 = arith.constant 127 : i32
    %3 = vector.broadcast %c127_i32 : i32 to vector<1x128xi32>
    %4 = arith.cmpi ne, %0, %3 : vector<1x128xi32>
    %c0 = arith.constant 0 : index
    %c0_0 = arith.constant 0 : index
    %c0_1 = arith.constant 0 : index
    %5 = vector.load %arg1[%c0, %c0_0, %c0_1] : memref<1x8x128xf32, #tpu.memory_space<vmem>>, vector<1x8x128xf32>
    %6 = vector.shape_cast %5 : vector<1x8x128xf32> to vector<8x128xf32>
    %c1_i32 = arith.constant 1 : i32
    %7 = tpu.dynamic_rotate %6 by %c1_i32 dim 1 : vector<8x128xf32>, i32 -> vector<8x128xf32>
    %cst = arith.constant 0.000000e+00 : f32
    %8 = vector.shape_cast %2 : vector<1x128xi1> to vector<1x128xi1>
    %9 = vector.broadcast %8 : vector<1x128xi1> to vector<8x128xi1>
    %10 = vector.broadcast %cst : f32 to vector<8x128xf32>
    %11 = arith.select %9, %7, %10 : vector<8x128xi1>, vector<8x128xf32>
    %c127_i32_2 = arith.constant 127 : i32
    %12 = tpu.dynamic_rotate %6 by %c127_i32_2 dim 1 : vector<8x128xf32>, i32 -> vector<8x128xf32>
    %cst_3 = arith.constant 0.000000e+00 : f32
    %13 = vector.shape_cast %4 : vector<1x128xi1> to vector<1x128xi1>
    %14 = vector.broadcast %13 : vector<1x128xi1> to vector<8x128xi1>
    %15 = vector.broadcast %cst_3 : f32 to vector<8x128xf32>
    %16 = arith.select %14, %12, %15 : vector<8x128xi1>, vector<8x128xf32>
    %c0_4 = arith.constant 0 : index
    %c0_5 = arith.constant 0 : index
    %c0_6 = arith.constant 0 : index
    %17 = vector.load %arg2[%c0_4, %c0_5, %c0_6] : memref<3x8x8xf32, #tpu.memory_space<vmem>>, vector<1x8x8xf32>
    %18 = vector.shape_cast %17 : vector<1x8x8xf32> to vector<8x8xf32>
    %cst_7 = arith.constant dense<0.000000e+00> : vector<8x128xf32>
    %19 = tpu.matmul %18, %11, %cst_7 {dimension_numbers = #tpu.dot_dimension_numbers<[1], [0], [0], [1], [0, 0, 1, 1], [], []>} : vector<8x8xf32>, vector<8x128xf32>, vector<8x128xf32> -> vector<8x128xf32>
    %c1 = arith.constant 1 : index
    %c0_8 = arith.constant 0 : index
    %c0_9 = arith.constant 0 : index
    %20 = vector.load %arg2[%c1, %c0_8, %c0_9] : memref<3x8x8xf32, #tpu.memory_space<vmem>>, vector<1x8x8xf32>
    %21 = vector.shape_cast %20 : vector<1x8x8xf32> to vector<8x8xf32>
    %cst_10 = arith.constant dense<0.000000e+00> : vector<8x128xf32>
    %22 = tpu.matmul %21, %6, %cst_10 {dimension_numbers = #tpu.dot_dimension_numbers<[1], [0], [0], [1], [0, 0, 1, 1], [], []>} : vector<8x8xf32>, vector<8x128xf32>, vector<8x128xf32> -> vector<8x128xf32>
    %23 = arith.addf %19, %22 : vector<8x128xf32>
    %c2 = arith.constant 2 : index
    %c0_11 = arith.constant 0 : index
    %c0_12 = arith.constant 0 : index
    %24 = vector.load %arg2[%c2, %c0_11, %c0_12] : memref<3x8x8xf32, #tpu.memory_space<vmem>>, vector<1x8x8xf32>
    %25 = vector.shape_cast %24 : vector<1x8x8xf32> to vector<8x8xf32>
    %cst_13 = arith.constant dense<0.000000e+00> : vector<8x128xf32>
    %26 = tpu.matmul %25, %16, %cst_13 {dimension_numbers = #tpu.dot_dimension_numbers<[1], [0], [0], [1], [0, 0, 1, 1], [], []>} : vector<8x8xf32>, vector<8x128xf32>, vector<8x128xf32> -> vector<8x128xf32>
    %27 = arith.addf %23, %26 : vector<8x128xf32>
    %c0_14 = arith.constant 0 : index
    %c0_15 = arith.constant 0 : index
    %28 = vector.load %arg3[%c0_14, %c0_15] : memref<8x1xf32, #tpu.memory_space<vmem>>, vector<8x1xf32>
    %29 = vector.broadcast %28 : vector<8x1xf32> to vector<8x128xf32>
    %30 = arith.addf %27, %29 : vector<8x128xf32>
    %cst_16 = arith.constant 0.000000e+00 : f32
    %31 = vector.broadcast %cst_16 : f32 to vector<8x128xf32>
    %32 = arith.maximumf %30, %31 : vector<8x128xf32>
    %c1_i32_17 = arith.constant 1 : i32
    %33 = tpu.dynamic_rotate %32 by %c1_i32_17 dim 1 : vector<8x128xf32>, i32 -> vector<8x128xf32>
    %cst_18 = arith.constant 0.000000e+00 : f32
    %34 = vector.shape_cast %2 : vector<1x128xi1> to vector<1x128xi1>
    %35 = vector.broadcast %34 : vector<1x128xi1> to vector<8x128xi1>
    %36 = vector.broadcast %cst_18 : f32 to vector<8x128xf32>
    %37 = arith.select %35, %33, %36 : vector<8x128xi1>, vector<8x128xf32>
    %c127_i32_19 = arith.constant 127 : i32
    %38 = tpu.dynamic_rotate %32 by %c127_i32_19 dim 1 : vector<8x128xf32>, i32 -> vector<8x128xf32>
    %cst_20 = arith.constant 0.000000e+00 : f32
    %39 = vector.shape_cast %4 : vector<1x128xi1> to vector<1x128xi1>
    %40 = vector.broadcast %39 : vector<1x128xi1> to vector<8x128xi1>
    %41 = vector.broadcast %cst_20 : f32 to vector<8x128xf32>
    %42 = arith.select %40, %38, %41 : vector<8x128xi1>, vector<8x128xf32>
    %c0_21 = arith.constant 0 : index
    %c0_22 = arith.constant 0 : index
    %c0_23 = arith.constant 0 : index
    %43 = vector.load %arg4[%c0_21, %c0_22, %c0_23] : memref<3x8x8xf32, #tpu.memory_space<vmem>>, vector<1x8x8xf32>
    %44 = vector.shape_cast %43 : vector<1x8x8xf32> to vector<8x8xf32>
    %cst_24 = arith.constant dense<0.000000e+00> : vector<8x128xf32>
    %45 = tpu.matmul %44, %37, %cst_24 {dimension_numbers = #tpu.dot_dimension_numbers<[1], [0], [0], [1], [0, 0, 1, 1], [], []>} : vector<8x8xf32>, vector<8x128xf32>, vector<8x128xf32> -> vector<8x128xf32>
    %c1_25 = arith.constant 1 : index
    %c0_26 = arith.constant 0 : index
    %c0_27 = arith.constant 0 : index
    %46 = vector.load %arg4[%c1_25, %c0_26, %c0_27] : memref<3x8x8xf32, #tpu.memory_space<vmem>>, vector<1x8x8xf32>
    %47 = vector.shape_cast %46 : vector<1x8x8xf32> to vector<8x8xf32>
    %cst_28 = arith.constant dense<0.000000e+00> : vector<8x128xf32>
    %48 = tpu.matmul %47, %32, %cst_28 {dimension_numbers = #tpu.dot_dimension_numbers<[1], [0], [0], [1], [0, 0, 1, 1], [], []>} : vector<8x8xf32>, vector<8x128xf32>, vector<8x128xf32> -> vector<8x128xf32>
    %49 = arith.addf %45, %48 : vector<8x128xf32>
    %c2_29 = arith.constant 2 : index
    %c0_30 = arith.constant 0 : index
    %c0_31 = arith.constant 0 : index
    %50 = vector.load %arg4[%c2_29, %c0_30, %c0_31] : memref<3x8x8xf32, #tpu.memory_space<vmem>>, vector<1x8x8xf32>
    %51 = vector.shape_cast %50 : vector<1x8x8xf32> to vector<8x8xf32>
    %cst_32 = arith.constant dense<0.000000e+00> : vector<8x128xf32>
    %52 = tpu.matmul %51, %42, %cst_32 {dimension_numbers = #tpu.dot_dimension_numbers<[1], [0], [0], [1], [0, 0, 1, 1], [], []>} : vector<8x8xf32>, vector<8x128xf32>, vector<8x128xf32> -> vector<8x128xf32>
    %53 = arith.addf %49, %52 : vector<8x128xf32>
    %c0_33 = arith.constant 0 : index
    %c0_34 = arith.constant 0 : index
    %54 = vector.load %arg5[%c0_33, %c0_34] : memref<8x1xf32, #tpu.memory_space<vmem>>, vector<8x1xf32>
    %55 = vector.broadcast %54 : vector<8x1xf32> to vector<8x128xf32>
    %56 = arith.addf %53, %55 : vector<8x128xf32>
    %57 = arith.addf %56, %6 : vector<8x128xf32>
    %cst_35 = arith.constant 0.000000e+00 : f32
    %58 = vector.broadcast %cst_35 : f32 to vector<8x128xf32>
    %59 = arith.maximumf %57, %58 : vector<8x128xf32>
    %c0_36 = arith.constant 0 : index
    %c0_37 = arith.constant 0 : index
    %c0_38 = arith.constant 0 : index
    %60 = vector.load %arg6[%c0_36, %c0_37, %c0_38] : memref<1x8x128xf32, #tpu.memory_space<vmem>>, vector<1x8x128xf32>
    %61 = vector.shape_cast %60 : vector<1x8x128xf32> to vector<8x128xf32>
    %62 = vector.shape_cast %59 : vector<8x128xf32> to vector<1x8x128xf32>
    tpu.vector_store %arg6[%c0_36, %c0_37, %c0_38], %62 {strides = array<i32>} : memref<1x8x128xf32, #tpu.memory_space<vmem>>, vector<1x8x128xf32>,
    return
  }
  func.func @transform_0(%arg0: i32) -> (i32, i32, i32) {
    %c0_i32 = arith.constant 0 : i32
    %c0_i32_0 = arith.constant 0 : i32
    %c0_i32_1 = arith.constant 0 : i32
    return %arg0, %c0_i32, %c0_i32_0 : i32, i32, i32
  }
  func.func @transform_1(%arg0: i32) -> (i32, i32, i32) {
    %c0_i32 = arith.constant 0 : i32
    %c0_i32_0 = arith.constant 0 : i32
    %c0_i32_1 = arith.constant 0 : i32
    %c0_i32_2 = arith.constant 0 : i32
    return %c0_i32, %c0_i32_0, %c0_i32_1 : i32, i32, i32
  }
  func.func @transform_2(%arg0: i32) -> (i32, i32) {
    %c0_i32 = arith.constant 0 : i32
    %c0_i32_0 = arith.constant 0 : i32
    %c0_i32_1 = arith.constant 0 : i32
    return %c0_i32, %c0_i32_0 : i32, i32
  }
  func.func @transform_3(%arg0: i32) -> (i32, i32, i32) {
    %c0_i32 = arith.constant 0 : i32
    %c0_i32_0 = arith.constant 0 : i32
    %c0_i32_1 = arith.constant 0 : i32
    %c0_i32_2 = arith.constant 0 : i32
    return %c0_i32, %c0_i32_0, %c0_i32_1 : i32, i32, i32
  }
  func.func @transform_4(%arg0: i32) -> (i32, i32) {
    %c0_i32 = arith.constant 0 : i32
    %c0_i32_0 = arith.constant 0 : i32
    %c0_i32_1 = arith.constant 0 : i32
    return %c0_i32, %c0_i32_0 : i32, i32
  }
  func.func @transform_5(%arg0: i32) -> (i32, i32, i32) {
    %c0_i32 = arith.constant 0 : i32
    %c0_i32_0 = arith.constant 0 : i32
    %c0_i32_1 = arith.constant 0 : i32
    return %arg0, %c0_i32, %c0_i32_0 : i32, i32, i32
  }
}

</mosaic_0001>

<bundles_post_ra>
// kernel: tpu_custom_call.1
= control target key start
LH: loop header
LB: loop body
LE: loop exit
PB: predicated region body
PF: predicated region fallthrough
CT: control target
= control target key end

     0   :  { %10 = vsyncpa [#allocation3], 0  ;;  %s1384_s0 = inlined_call_operand.hbm [shape: f32[2,8,128], index: 0, kind: input, shape index: {}]   ;;  %s1385_s1 = inlined_call_operand.hbm [shape: f32[3,8,8], index: 1, kind: input, shape index: {}]   ;;  %s1386_s2 = inlined_call_operand.vmem [shape: f32[8,1], index: 2, kind: input, shape index: {}]   ;;  %s1387_s3 = inlined_call_operand.vmem [shape: f32[3,8,8], index: 3, kind: input, shape index: {}]   ;;  %s1388_s4 = inlined_call_operand.vmem [shape: f32[8,1], index: 4, kind: input, shape index: {}]   ;;  %s1389_s5 = inlined_call_operand.hbm [shape: f32[2,8,128], index: 5, kind: output, shape index: {}]  }
   0x1   :  { %12 = vsyncpa [#allocation3 + $0x1], 0 }
   0x2   :  { %13 = vsyncpa [#allocation6], 0 }
   0x3   :  { %14 = vsyncpa [#allocation4], 0 }
   0x4   :  { %16 = vsyncpa [#allocation4 + $0x1], 0  ;;  %s1143_s18 = smov 0   ;;  %s1145_s19 = smov 0  }
   0x5   :  { %s1147_s20 = smov 0   ;;  %s1149_s21 = smov 0  }
   0x6 LB: > { %s1164_s22 = sadd.s32 4294967295, %s1101_s21   ;;  %s839_s23 = sadd.s32 4294967294, %s1101_s21   ;;  %s1101_s21 = sphi %s1149_s21, %s1409_s21   ;;  %s1097_s20 = sphi %s1147_s20, %s1408_s20   ;;  %s1093_s19 = sphi %s1145_s19, %s1407_s19   ;;  %s1089_s18 = sphi %s1143_s18, %s1406_s18  }
   0x7   : > { %p42_p0 = scmp.ne.s32.totalorder %s1093_s19, %s1089_s18  ;;  %p1390_p1 = scmp.eq.s32.totalorder %s1164_s22, 0 }
   0x8   : > { %p156_p3 = scmp.eq.s32.totalorder %s839_s23, 1  ;;  %p840_p5 = scmp.ge.s32.totalorder %s1101_s21, 1 }
   0x9   : > { %p1173_p4 = por %p1390_p1, %p42_p0  ;;  %p163_p7 = scmp.lt.s32.totalorder %s1101_s21, 3 }
   0xa   : > { %p1178_p6 = por %p156_p3, %p42_p0  ;;  %s1103_s27 = smov [#allocation5]  }
   0xb   : > { %s1393_s24 = scalar_select %p1173_p4, 1, 0 }
   0xc   : > { %s1394_s25 = scalar_select %p1178_p6, 1, 0 }
   0xd   : > { %p1183_p8 = pnand %p840_p5, %p163_p7  ;;  %s175_s28 = sshll.u32 %s1103_s27, 4  ;;  %s1187_s28 = int_to_ptr.vmem [resolvable:$true] %s175_s28 }
   0xe   : > { %s1199_s30 = sadd.s32 1, %s1101_s21   ;;  %s29_s6 = sadd.s32 1, %s1097_s20 }
   0xf   : > { %s1395_s26 = scalar_select %p1183_p8, 1, 0 }
  0x10   : > { %p915_p9 = pneg %p1183_p8  ;;  %s26_s7 = ssub.s32 %s1101_s21, %s1199_s30 }
  0x11   : > { %s973_s10 = scalar_lea.hbm %s1385_s1, 384 }
  0x12   : > { %p1194_p11 = pnand %p915_p9, %p1390_p1  ;;  %p974_p12 = scmp.ne.s32.totalorder %s1385_s1, %s973_s10 }
  0x13   : > { %p980_p5 = scmp.lt.u32.totalorder %s973_s10, %s1385_s1 }
  0x14   : > { %p975_p13 = pneg %p1194_p11 }
  0x16   : > { %p976_p0 = pnand %p975_p13, %p974_p12 }
  0x18   : > { %p977_p3 = pneg %p976_p0 }
  0x1a   : > { %p982_p7 = pnand %p980_p5, %p977_p3 }
  0x1c   : > { %985 = shalt.err (!%p982_p7)
}
  0x1d   : > { %s986_s15 = scalar_lea.vmem %s1187_s28, 384  ;;  %p994_p2 = scmp.lt.s32.totalorder %s1187_s28, %s1187_s28 }
  0x1e   : > { %p987_p9 = scmp.ne.s32.totalorder %s1187_s28, %s986_s15  ;;  %p995_p6 = scmp.lt.s32.totalorder %s986_s15, %s986_s15 }
  0x20   : > { %p989_p10 = pnand %p987_p9, %p975_p13  ;;  %p996_p4 = por %p995_p6, %p994_p2 }
  0x22   : > { %p990_p1 = pneg %p989_p10 }
  0x24   : > { %p997_p8 = pnand %p996_p4, %p990_p1 }
  0x26   : > { %1000 = shalt.err (!%p997_p8)
}
  0x27   : > { %s1104_s16 = smov 128   ;;  %s1105_s17 = smov 8  }
  0x28   : > { %918 = dma.hbm_to_vmem [thread:$0]  (!%p1194_p11), %s1385_s1, 384, %s1187_s28, [#allocation6], %s1104_s16, %s1104_s16, %s1105_s17  }
  0x29   : > { %p27_p2 = scmp.eq.s32.totalorder %s26_s7, 0  ;;  %p36_p1 = scmp.ne.s32.totalorder %s1097_s20, %s1093_s19 }
  0x2a   : > { %p37_p4 = scmp.eq.s32.totalorder %s1101_s21, 0  ;;  %p928_p6 = scmp.lt.s32.totalorder %s1101_s21, 2 }
  0x2b   : > { %s1230_s8 = scalar_select %p27_p2, %s1097_s20, %s29_s6  }
  0x2c   : > { %p38_p8 = por %p37_p4, %p36_p1  ;;  %p1397_p10 = scmp.eq.s32.totalorder %s1164_s22, 1 }
  0x2d   : > { %s198_s10 = sand.u32 1, %s1097_s20   ;;  %s844_s11 = sshll.u32 %s1101_s21, 7 }
  0x2e   : > { %p1234_p12 = por %p1397_p10, %p36_p1  ;;  %s843_s12 = sshll.u32 %s198_s10, 3 }
  0x2f   : > { %s1243_s14 = scalar_lea.hbm %s1384_s0, %s844_s11  ;;  %s202_s28 = scalar_lea.vmem [#allocation2], %s843_s12 }
  0x30   : > { %s209_s6 = sshll.u32 %s202_s28, 4  ;;  %p1245_p11 = pnand %p928_p6, %p38_p8  ;;  %s1249_s6 = int_to_ptr.vmem [resolvable:$true] %s209_s6 }
  0x31   : > { %s199_s15 = scalar_lea.sflag [#allocation3], %s198_s10  ;;  %s1001_s16 = scalar_lea.hbm %s1243_s14, 128 }
  0x32   : > { %p1002_p13 = scmp.ne.s32.totalorder %s1243_s14, %s1001_s16  ;;  %p1003_p0 = pneg %p1245_p11 }
  0x33   : > { %s1006_s27 = scalar_lea.hbm %s1384_s0, 256  ;;  %p1007_p7 = scmp.lt.u32.totalorder %s1243_s14, %s1384_s0 }
  0x34   : > { %p1004_p3 = pnand %p1003_p0, %p1002_p13  ;;  %p1008_p9 = scmp.lt.u32.totalorder %s1006_s27, %s1001_s16 }
  0x35   : > { %p1010_p1 = scmp.lt.u32.totalorder %s1001_s16, %s1243_s14 }
  0x36   : > { %p1005_p5 = pneg %p1004_p3  ;;  %p1009_p2 = por %p1008_p9, %p1007_p7 }
  0x38   : > { %p1011_p4 = por %p1010_p1, %p1009_p2 }
  0x3a   : > { %p1012_p6 = pnand %p1011_p4, %p1005_p5 }
  0x3c   : > { %1015 = shalt.err (!%p1012_p6)
}
  0x3d   : > { %s1016_s10 = scalar_lea.vmem %s1249_s6, 128  ;;  %s1106_s29 = smov [#allocation2]  }
  0x3e   : > { %p1017_p8 = scmp.ne.s32.totalorder %s1249_s6, %s1016_s10  ;;  %s1021_s13 = sshll.u32 %s1106_s29, 4  ;;  %s1022_s13 = int_to_ptr.vmem [resolvable:$false] %s1021_s13 }
  0x3f   : > { %s1023_s28 = scalar_lea.vmem %s1022_s13, 256  ;;  %p1024_p3 = scmp.lt.s32.totalorder %s1249_s6, %s1022_s13 }
  0x40   : > { %p1019_p10 = pnand %p1017_p8, %p1003_p0  ;;  %p1025_p7 = scmp.lt.s32.totalorder %s1023_s28, %s1016_s10 }
  0x42   : > { %p1020_p13 = pneg %p1019_p10  ;;  %p1026_p9 = por %p1025_p7, %p1024_p3 }
  0x44   : > { %p1027_p2 = pnand %p1026_p9, %p1020_p13 }
  0x46   : > { %1030 = shalt.err (!%p1027_p2)
}
  0x47   : > { %922 = dma.hbm_to_vmem [thread:$0]  (!%p1245_p11), %s1243_s14, 128, %s1249_s6, %s199_s15  }
  0x48   : > { %p1400_p5 = scmp.ne.s32.totalorder %s1395_s26, 0 }
  0x49   : > { %s1279_s16 = sand.u32 (!%p1400_p5), 1, %s1093_s19   ;;  %p1401_p0 = scmp.ne.s32.totalorder (!%p1400_p5), %s1393_s24, 0 }
  0x4a   : > { %218 = sbr.rel (%p1400_p5) target bundleno = 779 (0x30b), region = 40  ;;  %s846_s17 = sshll.u32 (!%p1400_p5), %s1279_s16, 3 }
  0x4b   : > { %s221_s23 = scalar_lea.sflag (!%p1400_p5), [#allocation3], %s1279_s16  ;;  %s224_s27 = scalar_lea.vmem (!%p1400_p5), [#allocation2], %s846_s17 }
  0x51   : > { %1076 = dma.done.wait (%p1401_p0), %s221_s23, 128  }
  0x52   : > { %1078 = vsyncadd (%p1401_p0), %s221_s23, 4294967168  ;;  %p1402_p11 = scmp.eq.s32.totalorder %s1164_s22, 0 }
  0x54   : > { %1080 = dma.done.wait (%p1402_p11), [#allocation6], 384   ;;  %p1403_p1 = pmov %p1402_p11 }
  0x55   : > { %v1107_v0 = vmov 0.0   ;;  %vm1108_vm0 = vmmov 0   ;;  %v1109_v1 = vmov 0   ;;  %vm273_vm1 = vcmask 64512   ;;  %v1295_v2 = vld [vmem:[%s224_s27] sm:$0xff]  ;;  %v272_v3 = vld [vmem:[#allocation5 + $0x8] sm:$0xff] }
  0x56   : > { %1082 = vsyncadd (%p1403_p1), [#allocation6], 4294966912  ;;  %877 = vmatprep.subr.mxu0 %v1107_v0  ;;  %879 = vmatprep.mubr.msk.f32.mxu0 %vm1108_vm0, %v1107_v0  ;;  %s1110_s24 = smov 1   ;;  %v496_v4 = vld [vmem:[%s1386_s2] sm:$0xff]  ;;  %s1111_s6 = smov 127   ;;  %v255_v5 = vlaneseq  ;;  %v270_v7 = vld [vmem:[#allocation5] sm:$0xff] }
  0x57   : > { %882 = vmatprep.subr.mxu1 %v1107_v0  ;;  %884 = vmatprep.mubr.msk.f32.mxu1 %vm1108_vm0, %v1107_v0  ;;  %v421_v9 = vld [vmem:[#allocation5 + $0x10] sm:$0xff]  ;;  %v854_v22 = vld [vmem:[%s1387_s3 + $0x8] sm:$0xff]  ;;  %v858_v25 = vld [vmem:[%s1387_s3 + $0x10] sm:$0xff]  ;;  %s862_s23 = sshll.u32 %s1164_s22, 7  ;;  %s254_s27 = scalar_lea.vmem [#allocation7], %s846_s17 }
  0x58   : > { %971 = vset.pattern.permute.xlu1 %v1109_v1  ;;  %972 = vset.pattern.permute.xlu0 %v1109_v1  ;;  %v256_v6 = vand.u32 127, %v255_v5  ;;  %v735_v23 = vld [vmem:[%s1388_s4] sm:$0xff]  ;;  %s746_s7 = scalar_lea.sflag [#allocation4], %s1279_s16  ;;  %s1112_s22 = smov [#allocation7]  }
  0x59   : > { %260 = vrot.lane.b32.xlu0 %v1295_v2, %s1110_s24  ;;  %878 = vmatpush3.msra.mxu0 %v1295_v2  ;;  %v510_v24 = vld [vmem:[%s1387_s3] sm:$0xff]  ;;  %s1035_s17 = sshll.u32 %s1112_s22, 4  ;;  %s1036_s17 = int_to_ptr.vmem [resolvable:$false] %s1035_s17 }
  0x5a   : > { %880 = vmatmul.mubr.msk.f32.vlgmr.msra.gmra.mrb[0].mxu0 %vm273_vm1, %v272_v3  ;;  %887 = vmatprep.subr.mxu0 %v1107_v0  ;;  %vm257_vm2 = vcmp.ne.s32.totalorder %v256_v6, 0  ;;  %vm258_vm3 = vcmp.ne.s32.totalorder %v256_v6, 127  ;;  %s1037_s11 = scalar_lea.vmem %s1036_s17, 256 }
  0x5b   : > { %889 = vmatprep.mubr.msk.f32.mxu0 %vm1108_vm0, %v1107_v0  ;;  %499 = vperm.xlu1 %971, %v496_v4  }
  0x5d   : > { %265 = vrot.lane.b32.xlu0 %v1295_v2, %s1111_s6 }
  0xcb   : > { %v261_v8 = vpop.permute.xlu0 %260 }
  0xcc   : > { %883 = vmatpush3.msk.msra.mxu1 %vm257_vm2, %v261_v8 }
  0xcd   : > { %885 = vmatmul.mubr.msk.f32.vlgmr.msra.gmra.mrb[0].mxu1 %vm273_vm1, %v270_v7  ;;  %892 = vmatprep.subr.mxu1 %v1107_v0 }
  0xce   : > { %894 = vmatprep.mubr.msk.f32.mxu1 %vm1108_vm0, %v1107_v0 }
  0xcf   : > { %v266_v10 = vpop.permute.xlu0 %265 }
  0xd0   : > { %888 = vmatpush3.msk.msra.mxu0 %vm258_vm3, %v266_v10 }
  0xd1   : > { %890 = vmatmul.mubr.msk.f32.vlgmr.msra.gmra.mrb[2].mxu0 %vm273_vm1, %v421_v9  ;;  %897 = vmatprep.subr.mxu0 %v1107_v0 }
  0xd2   : > { %899 = vmatprep.mubr.msk.f32.mxu0 %vm1108_vm0, %v1107_v0 }
  0xda   : > { %v500_v17 = vpop.permute.xlu1 %499 }
 0x12d   : > { %v343_v11 = vpop.f32.mrb[0].mxu0 }
 0x12e   : > { %v881_v12 = vpop.f32.mrb[1].mxu0 }
 0x1a0   : > { %v416_v13 = vpop.f32.mrb[0].mxu1 }
 0x1a1   : > { %v417_v14 = vadd.f32 %v416_v13, %v343_v11  ;;  %v886_v15 = vpop.f32.mrb[1].mxu1 }
 0x1a4   : > { %v491_v16 = vpop.f32.mrb[2].mxu0 }
 0x1a5   : > { %v495_v18 = vadd.f32 %v491_v16, %v417_v14  ;;  %v891_v19 = vpop.f32.mrb[3].mxu0 }
 0x1a7   : > { %v502_v20 = vadd.f32 %v500_v17, %v495_v18 }
 0x1a9   : > { %v503_v21 = vmax.f32 %v502_v20, 0.0 }
 0x1ab   : > { %507 = vrot.lane.b32.xlu0 %v503_v21, %s1111_s6  ;;  %504 = vrot.lane.b32.xlu1 %v503_v21, %s1110_s24  ;;  %s759_s24 = sshll.u32 %s254_s27, 4  ;;  %s1340_s6 = scalar_lea.hbm %s1389_s5, %s862_s23  ;;  %s1342_s24 = int_to_ptr.vmem [resolvable:$true] %s759_s24 }
 0x1ac   : > { %893 = vmatpush3.msra.mxu1 %v503_v21  ;;  %s1031_s15 = scalar_lea.vmem %s1342_s24, 128  ;;  %p1038_p10 = scmp.lt.s32.totalorder %s1342_s24, %s1036_s17 }
 0x1ad   : > { %895 = vmatmul.mubr.msk.f32.vlgmr.msra.gmra.mrb[2].mxu1 %vm273_vm1, %v854_v22  ;;  %902 = vmatprep.subr.mxu1 %v1107_v0  ;;  %p1032_p4 = scmp.ne.s32.totalorder %s1342_s24, %s1031_s15  ;;  %p1039_p13 = scmp.lt.s32.totalorder %s1037_s11, %s1031_s15 }
 0x1ae   : > { %904 = vmatprep.mubr.msk.f32.mxu1 %vm1108_vm0, %v1107_v0 }
 0x1af   : > { %738 = vperm.xlu1 %971, %v735_v23   ;;  %p1033_p6 = pnand %p1032_p4, %p1234_p12  ;;  %p1040_p3 = por %p1039_p13, %p1038_p10 }
 0x1b1   : > { %p1034_p8 = pneg %p1033_p6 }
 0x1b3   : > { %p1041_p7 = pnand %p1040_p3, %p1034_p8 }
 0x21d   : > { %v508_v26 = vpop.permute.xlu0 %507  ;;  %v505_v27 = vpop.permute.xlu1 %504 }
 0x21e   : > { %898 = vmatpush3.msk.msra.mxu0 %vm257_vm2, %v505_v27  ;;  %903 = vmatpush3.msk.msra.mxu1 %vm258_vm3, %v508_v26 }
 0x21f   : > { %900 = vmatmul.mubr.msk.f32.vlgmr.msra.gmra.mrb[4].mxu0 %vm273_vm1, %v510_v24  ;;  %905 = vmatmul.mubr.msk.f32.vlgmr.msra.gmra.mrb[4].mxu1 %vm273_vm1, %v858_v25 }
 0x22e   : > { %v739_v36 = vpop.permute.xlu1 %738 }
 0x280   : > { %v582_v28 = vpop.f32.mrb[2].mxu1 }
 0x281   : > { %v896_v29 = vpop.f32.mrb[3].mxu1 }
 0x2f2   : > { %v655_v30 = vpop.f32.mrb[4].mxu0  ;;  %v730_v31 = vpop.f32.mrb[4].mxu1 }
 0x2f3   : > { %v656_v32 = vadd.f32 %v655_v30, %v582_v28  ;;  %v901_v33 = vpop.f32.mrb[5].mxu0  ;;  %v906_v34 = vpop.f32.mrb[5].mxu1 }
 0x2f5   : > { %v734_v35 = vadd.f32 %v730_v31, %v656_v32 }
 0x2f7   : > { %v741_v37 = vadd.f32 %v739_v36, %v734_v35 }
 0x2f9   : > { %v742_v38 = vadd.f32 %v741_v37, %v1295_v2 }
 0x2fb   : > { %v743_v39 = vmax.f32 %v742_v38, 0.0 }
 0x2fd   : > { %744 = vst [vmem:[%s254_s27] sm:$0xff] %v743_v39 }
 0x2fe   : > { %1044 = shalt.err (!%p1041_p7)
}
 0x2ff   : > { %s1045_s16 = scalar_lea.hbm %s1340_s6, 128  ;;  %s1049_s29 = scalar_lea.hbm %s1389_s5, 256 }
 0x300   : > { %p1046_p9 = scmp.ne.s32.totalorder %s1340_s6, %s1045_s16  ;;  %p1050_p0 = scmp.lt.u32.totalorder %s1340_s6, %s1389_s5 }
 0x301   : > { %p1051_p11 = scmp.lt.u32.totalorder %s1049_s29, %s1045_s16  ;;  %p1053_p4 = scmp.lt.u32.totalorder %s1045_s16, %s1340_s6 }
 0x302   : > { %p1047_p2 = pnand %p1046_p9, %p1234_p12 }
 0x303   : > { %p1052_p1 = por %p1051_p11, %p1050_p0 }
 0x304   : > { %p1048_p5 = pneg %p1047_p2 }
 0x305   : > { %p1054_p6 = por %p1053_p4, %p1052_p1 }
 0x307   : > { %p1055_p8 = pnand %p1054_p6, %p1048_p5 }
 0x309   : > { %1058 = shalt.err (!%p1055_p8)
}
 0x30a   : > { %913 = dma.vmem_to_hbm [thread:$0]  (%p1234_p12), %s1342_s24, 128, %s1340_s6, %s746_s7  }
 0x30b PF: > { %s771_s23 = sand.u32 1, %s1089_s18   ;;  %p1404_p10 = scmp.ne.s32.totalorder %s1394_s25, 0 }
 0x30c   : > { %p1405_p13 = scmp.ge.s32.totalorder %s1101_s21, 2  ;;  %s772_s27 = scalar_lea.sflag [#allocation4], %s771_s23 }
 0x30e   : > { %p924_p3 = pnand %p1405_p13, %p1404_p10 }
 0x310   : > { %1084 = dma.done.wait (!%p924_p3), %s772_s27, 128  }
 0x311   : > { %1086 = vsyncadd (!%p924_p3), %s772_s27, 4294967168  ;;  %p19_p7 = scmp.ge.s32.totalorder %s1199_s30, 4   ;;  %s1406_s18 = smov %s1093_s19 }
 0x312   : > { %s1407_s19 = smov %s1097_s20  ;;  %s1408_s20 = smov %s1230_s8 }
 0x313   : > { %s1409_s21 = smov %s1199_s30  ;;  %21 = sbr.rel (!%p19_p7) target bundleno = 6 (0x6), region = 93 }
 0x31a   :  { %777 = vsyncpa [#allocation3], 1 }
 0x31b   :  { %779 = vsyncpa [#allocation3 + $0x1], 1 }
 0x31c   :  { %780 = vsyncpa [#allocation6], 1 }
 0x31d   :  { %781 = vsyncpa [#allocation4], 1 }
 0x31e   :  { %783 = vsyncpa [#allocation4 + $0x1], 1 }

</bundles_post_ra>
